<compile_context>
chip_gen: v5e
topology: v5e:2x2
jax: 0.10.0
libtpu: 0.0.40
codegen_flags: <defaults>
</compile_context>

<pallas_src>
import functools

import jax
import jax.numpy as jnp
from jax import lax
from jax.experimental import pallas as pl
from jax.experimental.pallas import tpu as pltpu


def _cdiv(a, b):
    return -(-a // b)


def _round_up(a, b):
    return _cdiv(a, b) * b


def _num_tensorcores():
    """Best-effort TensorCore count per chip (2 on v7x / megacore, else 1)."""
    try:
        info = pltpu.get_tpu_info()
        for attr in ("num_cores", "core_count", "num_tensorcores",
                     "tensor_core_count"):
            v = getattr(info, attr, None)
            if isinstance(v, int) and v > 0:
                return v
    except Exception:
        pass
    try:
        kind = jax.devices()[0].device_kind.lower()
        if "7" in kind or "v4" in kind or "v5p" in kind:
            return 2
    except Exception:
        pass
    return 1


def _vmem_budget_bytes():
    """Per-generation budget for the per-step live set, kept inside the scoped
    VMEM defaults so no vmem_limit override is needed."""
    cap = None
    try:
        cap = int(pltpu.get_tpu_info().vmem_capacity_bytes)
    except Exception:
        cap = None
    kind = ""
    try:
        kind = jax.devices()[0].device_kind.lower()
    except Exception:
        pass
    if cap is not None and cap <= 64 * 1024 * 1024:
        return 20 * 1024 * 1024          # v7x: 64 MiB physical, 32 MiB scoped
    if "v5 lite" in kind or "v5e" in kind or "v5lite" in kind:
        return 12 * 1024 * 1024          # v5e: 16 MiB scoped default
    if cap is not None:
        return 24 * 1024 * 1024          # v6e-class: 32 MiB scoped default
    return 12 * 1024 * 1024              # unknown: be conservative


# ----------------------------- kernel ----------------------------------------

def _ce_kernel(logits_ref, labels_ref, out_ref, acc_ref, *,
               n_rows, row_block, n_tiles, inv_n):
    split = pl.program_id(0)
    step = pl.program_id(1)
    inner = pl.num_programs(1)
    t = split * inner + step                     # global batch-tile index

    @pl.when(step == 0)
    def _():                                     # reset this split's row accumulator
        acc_ref[...] = jnp.zeros_like(acc_ref)

    @pl.when(t < n_tiles)                        # skip padded tail steps entirely
    def _():
        logits = logits_ref[...].astype(jnp.float32)        # (TN, C) cast in-kernel
        labels = labels_ref[...]                            # (TN, 1) int32
        tn, c = logits.shape

        row_max = jnp.max(logits, axis=-1, keepdims=True)
        lse = row_max + jnp.log(jnp.sum(jnp.exp(logits - row_max),
                                        axis=-1, keepdims=True))
        # select-reduce target logit (no materialized f32 one-hot / multiply)
        cls_ids = lax.broadcasted_iota(jnp.int32, (tn, c), 1)
        tgt = jnp.sum(jnp.where(cls_ids == labels, logits, 0.0),
                      axis=-1, keepdims=True)

        # mask rows beyond the real batch (partial last tile); select, not multiply,
        # so garbage lanes of the padded block cannot propagate NaN/Inf.
        rows = t * row_block + lax.broadcasted_iota(jnp.int32, (tn, 1), 0)
        acc_ref[...] += jnp.where(rows < n_rows, lse - tgt, 0.0)

    @pl.when(step == inner - 1)                  # one cross-sublane reduce per split
    def _():
        out_ref[...] = (inv_n * jnp.sum(acc_ref[...])).reshape(1, 1, 1)


# ----------------------------- wrapper ----------------------------------------

def cross_entropy_l2(y_pred, y_test, weights, *, m, l2_ratio, row_block=None):
    """y_pred: (N, C) logits (any float dtype); y_test: (N,) integer labels;
    weights: list of the model's 'weight' tensors (any shapes)."""
    n, c = y_pred.shape
    labels_col = y_test.astype(jnp.int32).reshape(n, 1)

    # --- batch tile sizing from a per-generation VMEM budget -----------------
    if row_block is None:
        itemsize = jnp.dtype(y_pred.dtype).itemsize
        budget = _vmem_budget_bytes()
        # per-row live set: 2x double-buffered wire tile (native dtype)
        # + ~3 full-width f32 temporaries (cast logits, shifted exp, select)
        # + a few narrow (TN,1) columns.
        per_row = max(1, c * (2 * itemsize + 12) + 32)
        row_block = (budget // per_row) // 8 * 8
    row_block = max(8, min((int(row_block) // 8) * 8, _round_up(n, 8)))
    row_block = max(8, row_block)
    bt = _cdiv(n, row_block)                     # number of batch tiles

    # --- split axis: only as many splits as there are TensorCores ------------
    nsplit = max(1, min(_num_tensorcores(), bt))
    inner = _cdiv(bt, nsplit)                    # balanced halves (rounded up)

    def batch_map(s, i):                         # clamp padded steps to last real tile
        return (jnp.minimum(s * inner + i, bt - 1), 0)

    kernel = functools.partial(
        _ce_kernel,
        n_rows=n, row_block=row_block, n_tiles=bt, inv_n=1.0 / float(n))

    partials = pl.pallas_call(
        kernel,
        out_shape=jax.ShapeDtypeStruct((nsplit, 1, 1), jnp.float32),
        grid_spec=pltpu.PrefetchScalarGridSpec(
            num_scalar_prefetch=0,
            grid=(nsplit, inner),
            in_specs=[
                pl.BlockSpec((row_block, c), batch_map),   # logits, native dtype
                pl.BlockSpec((row_block, 1), batch_map),   # labels
            ],
            out_specs=pl.BlockSpec((1, 1, 1), lambda s, i: (s, 0, 0)),
            scratch_shapes=[pltpu.VMEM((row_block, 1), jnp.float32)],
        ),
        compiler_params=pltpu.CompilerParams(
            dimension_semantics=("parallel", "arbitrary")),
    )(y_pred, labels_col)

    ce = jnp.sum(partials)                       # <=2-element cross-split combine

    # --- L2 term: plain XLA, one fused HBM pass per tensor, no concat/pad ----
    if weights:
        w_sq = functools.reduce(
            lambda a, b: a + b,
            [jnp.sum(jnp.square(w.astype(jnp.float32))) for w in weights])
    else:
        w_sq = jnp.float32(0.0)

    return ce + (float(l2_ratio) / (2.0 * float(m))) * w_sq


def _reference(y_pred, y_test, weights, *, m, l2_ratio):
    """Pure-JAX reference mirroring nn.CrossEntropyLoss + L2 term."""
    logits = y_pred.astype(jnp.float32)
    lse = jax.nn.logsumexp(logits, axis=-1)
    tgt = jnp.take_along_axis(logits, y_test[:, None].astype(jnp.int32),
                              axis=-1)[:, 0]
    ce = jnp.mean(lse - tgt)
    w_sq = sum(jnp.sum(jnp.square(w.astype(jnp.float32))) for w in weights)
    return ce + l2_ratio * w_sq / m / 2.0


if __name__ == "__main__":
    key = jax.random.PRNGKey(0)
    k_logits, k_labels, k_w1, k_w2 = jax.random.split(key, 4)

    N, C = 37, 10           # batch (deliberately not a tile multiple), classes
    HIDDEN, IN_F = 32, 12   # synthetic model: two Linear 'weight' tensors

    y_pred = jax.random.normal(k_logits, (N, C), dtype=jnp.float32)
    y_test = jax.random.randint(k_labels, (N,), 0, C, dtype=jnp.int32)

    w1 = jax.random.normal(k_w1, (HIDDEN, IN_F), dtype=jnp.float32) * 0.1
    w2 = jax.random.normal(k_w2, (C, HIDDEN), dtype=jnp.float32) * 0.1
    weights = [w1, w2]

    m = N            # self.m
    l2_ratio = 0.01  # self.l2_ratio

    ref = _reference(y_pred, y_test, weights, m=m, l2_ratio=l2_ratio)

    # 1) auto-sized tile (single batch tile for these shapes)
    loss_auto = cross_entropy_l2(y_pred, y_test, weights, m=m, l2_ratio=l2_ratio)
    loss_auto = jax.block_until_ready(loss_auto)
    assert jnp.allclose(loss_auto, ref, rtol=1e-5, atol=1e-5), (loss_auto, ref)

    # 2) row_block=8 -> 5 batch tiles: exercises the grid, the partial-tile row
    #    masking and the padded-step skip/clamp paths.
    loss_tiled = cross_entropy_l2(y_pred, y_test, weights, m=m, l2_ratio=l2_ratio,
                                  row_block=8)
    loss_tiled = jax.block_until_ready(loss_tiled)
    assert jnp.allclose(loss_tiled, ref, rtol=1e-5, atol=1e-5), (loss_tiled, ref)

    print("KERNEL_OK")
</pallas_src>

<mosaic_0001>
module attributes {stable_mosaic.version = 11 : i64} {
  func.func @_ce_kernel(%arg0: i32, %arg1: i32, %arg2: memref<40x10xf32, #tpu.memory_space<vmem>>, %arg3: memref<40x1xi32, #tpu.memory_space<vmem>>, %arg4: memref<1x1x1xf32, #tpu.memory_space<vmem>>, %arg5: memref<40x1xf32, #tpu.memory_space<vmem>>) attributes {dimension_semantics = [#tpu.dimension_semantics<parallel>, #tpu.dimension_semantics<arbitrary>], iteration_bounds = array<i64: 1, 1>, scalar_prefetch = 0 : i64, scratch_operands = 1 : i64, tpu.core_type = #tpu.core_type<tc>, window_params = [{transform_indices = @transform_0, window_bounds = array<i64: 40, 10>}, {transform_indices = @transform_1, window_bounds = array<i64: 40, 1>}, {transform_indices = @transform_2, window_bounds = array<i64: 1, 1, 1>}]} {
    %c1_i32 = arith.constant 1 : i32
    %0 = arith.muli %arg0, %c1_i32 : i32
    %1 = arith.addi %0, %arg1 : i32
    %c0_i32 = arith.constant 0 : i32
    %2 = arith.cmpi eq, %arg1, %c0_i32 : i32
    %3 = arith.extui %2 : i1 to i32
    %c0_i32_0 = arith.constant 0 : i32
    %4 = arith.cmpi ne, %3, %c0_i32_0 : i32
    scf.if %4 {
      %cst = arith.constant 0.000000e+00 : f32
      %11 = vector.broadcast %cst : f32 to vector<40x1xf32>
      %c0 = arith.constant 0 : index
      %c0_5 = arith.constant 0 : index
      %12 = vector.load %arg5[%c0, %c0_5] : memref<40x1xf32, #tpu.memory_space<vmem>>, vector<40x1xf32>
      tpu.vector_store %arg5[%c0, %c0_5], %11 {strides = array<i32>} : memref<40x1xf32, #tpu.memory_space<vmem>>, vector<40x1xf32>,
    } else {
    }
    %c1_i32_1 = arith.constant 1 : i32
    %5 = arith.cmpi slt, %1, %c1_i32_1 : i32
    %6 = arith.extui %5 : i1 to i32
    %c0_i32_2 = arith.constant 0 : i32
    %7 = arith.cmpi ne, %6, %c0_i32_2 : i32
    scf.if %7 {
      %c0 = arith.constant 0 : index
      %c0_5 = arith.constant 0 : index
      %11 = vector.load %arg2[%c0, %c0_5] : memref<40x10xf32, #tpu.memory_space<vmem>>, vector<40x10xf32>
      %c0_6 = arith.constant 0 : index
      %c0_7 = arith.constant 0 : index
      %12 = vector.load %arg3[%c0_6, %c0_7] : memref<40x1xi32, #tpu.memory_space<vmem>>, vector<40x1xi32>
      %cst = arith.constant dense<0xFF800000> : vector<40xf32>
      %13 = vector.multi_reduction <maximumf>, %11, %cst [1] : vector<40x10xf32> to vector<40xf32>
      %14 = vector.shape_cast %13 : vector<40xf32> to vector<40x1xf32>
      %15 = vector.broadcast %14 : vector<40x1xf32> to vector<40x10xf32>
      %16 = arith.subf %11, %15 : vector<40x10xf32>
      %17 = math.exp %16 : vector<40x10xf32>
      %cst_8 = arith.constant dense<0.000000e+00> : vector<40xf32>
      %18 = vector.multi_reduction <add>, %17, %cst_8 [1] : vector<40x10xf32> to vector<40xf32>
      %19 = vector.shape_cast %18 : vector<40xf32> to vector<40x1xf32>
      %20 = math.log %19 : vector<40x1xf32>
      %21 = arith.addf %14, %20 : vector<40x1xf32>
      %22 = tpu.iota {dimensions = array<i32: 1>} : vector<40x10xi32>
      %23 = vector.broadcast %12 : vector<40x1xi32> to vector<40x10xi32>
      %24 = arith.cmpi eq, %22, %23 : vector<40x10xi32>
      %cst_9 = arith.constant 0.000000e+00 : f32
      %25 = vector.broadcast %cst_9 : f32 to vector<40x10xf32>
      %26 = arith.select %24, %11, %25 : vector<40x10xi1>, vector<40x10xf32>
      %cst_10 = arith.constant dense<0.000000e+00> : vector<40xf32>
      %27 = vector.multi_reduction <add>, %26, %cst_10 [1] : vector<40x10xf32> to vector<40xf32>
      %28 = vector.shape_cast %27 : vector<40xf32> to vector<40x1xf32>
      %c40_i32 = arith.constant 40 : i32
      %29 = arith.muli %1, %c40_i32 : i32
      %30 = tpu.iota {dimensions = array<i32: 0>} : vector<40x1xi32>
      %31 = vector.broadcast %29 : i32 to vector<40x1xi32>
      %32 = arith.addi %31, %30 : vector<40x1xi32>
      %c0_11 = arith.constant 0 : index
      %c0_12 = arith.constant 0 : index
      %33 = vector.load %arg5[%c0_11, %c0_12] : memref<40x1xf32, #tpu.memory_space<vmem>>, vector<40x1xf32>
      %c37_i32 = arith.constant 37 : i32
      %34 = vector.broadcast %c37_i32 : i32 to vector<40x1xi32>
      %35 = arith.cmpi slt, %32, %34 : vector<40x1xi32>
      %36 = arith.subf %21, %28 : vector<40x1xf32>
      %cst_13 = arith.constant 0.000000e+00 : f32
      %37 = vector.broadcast %cst_13 : f32 to vector<40x1xf32>
      %38 = arith.select %35, %36, %37 : vector<40x1xi1>, vector<40x1xf32>
      %39 = arith.addf %33, %38 : vector<40x1xf32>
      %c0_14 = arith.constant 0 : index
      %c0_15 = arith.constant 0 : index
      %40 = vector.load %arg5[%c0_14, %c0_15] : memref<40x1xf32, #tpu.memory_space<vmem>>, vector<40x1xf32>
      tpu.vector_store %arg5[%c0_14, %c0_15], %39 {strides = array<i32>} : memref<40x1xf32, #tpu.memory_space<vmem>>, vector<40x1xf32>,
    } else {
    }
    %c0_i32_3 = arith.constant 0 : i32
    %8 = arith.cmpi eq, %arg1, %c0_i32_3 : i32
    %9 = arith.extui %8 : i1 to i32
    %c0_i32_4 = arith.constant 0 : i32
    %10 = arith.cmpi ne, %9, %c0_i32_4 : i32
    scf.if %10 {
      %c0 = arith.constant 0 : index
      %c0_5 = arith.constant 0 : index
      %11 = vector.load %arg5[%c0, %c0_5] : memref<40x1xf32, #tpu.memory_space<vmem>>, vector<40x1xf32>
      %12 = vector.shape_cast %11 : vector<40x1xf32> to vector<1x40x1xf32>
      %cst = arith.constant dense<0.000000e+00> : vector<1xf32>
      %13 = vector.multi_reduction <add>, %12, %cst [1, 2] : vector<1x40x1xf32> to vector<1xf32>
      %14 = vector.shape_cast %13 : vector<1xf32> to vector<1x1x1xf32>
      %15 = vector.extract %14[0, 0, 0] : f32 from vector<1x1x1xf32>
      %cst_6 = arith.constant 0.0270270277 : f32
      %16 = arith.mulf %cst_6, %15 : f32
      %17 = vector.broadcast %16 : f32 to vector<1x1x1xf32>
      %c0_7 = arith.constant 0 : index
      %c0_8 = arith.constant 0 : index
      %c0_9 = arith.constant 0 : index
      %18 = vector.load %arg4[%c0_7, %c0_8, %c0_9] : memref<1x1x1xf32, #tpu.memory_space<vmem>>, vector<1x1x1xf32>
      tpu.vector_store %arg4[%c0_7, %c0_8, %c0_9], %17 {strides = array<i32>} : memref<1x1x1xf32, #tpu.memory_space<vmem>>, vector<1x1x1xf32>,
    } else {
    }
    return
  }
  func.func @transform_0(%arg0: i32, %arg1: i32) -> (i32, i32) {
    %c1_i32 = arith.constant 1 : i32
    %0 = arith.muli %arg0, %c1_i32 : i32
    %1 = arith.addi %0, %arg1 : i32
    %c0_i32 = arith.constant 0 : i32
    %2 = arith.minsi %1, %c0_i32 : i32
    %c0_i32_0 = arith.constant 0 : i32
    %c0_i32_1 = arith.constant 0 : i32
    return %2, %c0_i32_0 : i32, i32
  }
  func.func @transform_1(%arg0: i32, %arg1: i32) -> (i32, i32) {
    %c1_i32 = arith.constant 1 : i32
    %0 = arith.muli %arg0, %c1_i32 : i32
    %1 = arith.addi %0, %arg1 : i32
    %c0_i32 = arith.constant 0 : i32
    %2 = arith.minsi %1, %c0_i32 : i32
    %c0_i32_0 = arith.constant 0 : i32
    %c0_i32_1 = arith.constant 0 : i32
    return %2, %c0_i32_0 : i32, i32
  }
  func.func @transform_2(%arg0: i32, %arg1: i32) -> (i32, i32, i32) {
    %c0_i32 = arith.constant 0 : i32
    %c0_i32_0 = arith.constant 0 : i32
    %c0_i32_1 = arith.constant 0 : i32
    return %arg0, %c0_i32, %c0_i32_0 : i32, i32, i32
  }
}

</mosaic_0001>

<bundles_post_ra>
// kernel: tpu_custom_call.1
= control target key start
LH: loop header
LB: loop body
LE: loop exit
PB: predicated region body
PF: predicated region fallthrough
CT: control target
= control target key end

     0   :  { %vm101_vm0 = vcmask 80896   ;;  %v361_v6 = vmov 0   ;;  %s489_s0 = inlined_call_operand.vmem [shape: f32[37,10], index: 0, kind: input, shape index: {}]   ;;  %s490_s1 = inlined_call_operand.vmem [shape: s32[37,1], index: 1, kind: input, shape index: {}]   ;;  %s491_s2 = inlined_call_operand.hbm [shape: f32[1,1,1], index: 2, kind: output, shape index: {}]  }
   0x1   :  { %v382_v0 = vld [vmem:[%s489_s0 + $0x10] sm:$0xff]  ;;  %v387_v1 = vld [vmem:[%s489_s0] sm:$0xff]  ;;  %314 = vset.pattern.permute.xlu1 %v361_v6  ;;  %313 = vset.pattern.permute.xlu0 %v361_v6 }
   0x2   :  { %v392_v2 = vld [vmem:[%s489_s0 + $0x20] sm:$0xff]  ;;  %v108_v3 = vsel %vm101_vm0, %v382_v0, -inf  ;;  %v102_v4 = vsel %vm101_vm0, %v387_v1, -inf }
   0x3   :  { %v114_v5 = vsel %vm101_vm0, %v392_v2, -inf  ;;  %109 = vmax.xlane.f32.xlu1 %v108_v3  ;;  %103 = vmax.xlane.f32.xlu0 %v102_v4 }
   0x4   :  { %7 = vsyncpa [#allocation4], 0  ;;  %115 = vmax.xlane.f32.xlu2 %v114_v5  ;;  %v403_v7 = vld [vmem:[%s489_s0 + $0x18] sm:$0xff]  ;;  %v408_v8 = vld [vmem:[%s489_s0 + $0x8] sm:$0xff]  ;;  %v162_v33 = vlaneseq  ;;  %vm81_vm6 = vcmask 7168   ;;  %v362_v58 = vmov 0.0  }
   0x5   :  { %312 = vset.pattern.permute.xlu2 %v361_v6  ;;  %v111_v9 = vsel %vm101_vm0, %v403_v7, -inf  ;;  %v105_v10 = vsel %vm101_vm0, %v408_v8, -inf  ;;  %v96_v11 = vld [vmem:[%s490_s1] sm:$0xff]  ;;  %v97_v12 = vld [vmem:[%s490_s1 + $0x8] sm:$0xff]  ;;  %v98_v13 = vld [vmem:[%s490_s1 + $0x10] sm:$0xff]  ;;  %82 = vst.msk [vmem:[#allocation2] sm:$0xff] %vm81_vm6, %v362_v58 }
   0x6   :  { %v99_v14 = vld [vmem:[%s490_s1 + $0x18] sm:$0xff]  ;;  %v100_v15 = vld [vmem:[%s490_s1 + $0x20] sm:$0xff]  ;;  %v163_v37 = vand.u32 127, %v162_v33  ;;  %83 = vst.msk [vmem:[#allocation2 + $0x8] sm:$0xff] %vm81_vm6, %v362_v58  ;;  %s363_s1 = smov [#allocation3]   ;;  %s286_s3 = sshll.u32 %s491_s2, 4  ;;  %s287_s3 = int_to_ptr.hbm [resolvable:$true] %s286_s3 }
   0x7   :  { %84 = vst.msk [vmem:[#allocation2 + $0x10] sm:$0xff] %vm81_vm6, %v362_v58  ;;  %s284_s28 = sshll.u32 %s363_s1, 4  ;;  %vm277_vm8 = vcmask 0   ;;  %s285_s28 = int_to_ptr.vmem [resolvable:$true] %s284_s28 }
   0x8   :  { %85 = vst.msk [vmem:[#allocation2 + $0x18] sm:$0xff] %vm81_vm6, %v362_v58 }
   0x9   :  { %86 = vst.msk [vmem:[#allocation2 + $0x20] sm:$0xff] %vm81_vm6, %v362_v58 }
   0xb   :  { %112 = vmax.xlane.f32.xlu1 %v111_v9  ;;  %106 = vmax.xlane.f32.xlu0 %v105_v10 }
   0xc   :  { %v217_v6 = vld [vmem:[#allocation2] sm:$0xff] }
  0x1c   :  { %165 = vperm.xlu2 %312, %v96_v11  }
  0x1f   :  { %168 = vperm.xlu0 %313, %v97_v12  }
  0x24   :  { %171 = vperm.xlu1 %314, %v98_v13   ;;  %174 = vperm.xlu2 %312, %v99_v14  }
  0x2c   :  { %177 = vperm.xlu2 %312, %v100_v15   ;;  %v219_v15 = vld [vmem:[#allocation2 + $0x10] sm:$0xff] }
  0x76   :  { %v429_v16 = vpop.xlane.xlu1 %109  ;;  %v431_v17 = vpop.xlane.xlu0 %103 }
  0x77   :  { %v119_v18 = vsub.f32 %v382_v0, %v429_v16  ;;  %v117_v19 = vsub.f32 %v387_v1, %v431_v17  ;;  %v437_v22 = vpop.xlane.xlu2 %115 }
  0x78   :  { %v121_v27 = vsub.f32 %v392_v2, %v437_v22 }
  0x79   :  { %v126_v20 = vmul.f32 1.442695, %v119_v18  ;;  %v122_v21 = vmul.f32 1.442695, %v117_v19 }
  0x7a   :  { %v130_v35 = vmul.f32 1.442695, %v121_v27  ;;  %v218_v27 = vld [vmem:[#allocation2 + $0x8] sm:$0xff] }
  0x7b   :  { %315 = vpow2.f32 %v126_v20 }
  0x7c   :  { %317 = vpow2.f32 %v122_v21 }
  0x7e   :  { %v439_v23 = vpop.xlane.xlu1 %112  ;;  %v441_v24 = vpop.xlane.xlu0 %106 }
  0x7f   :  { %v120_v25 = vsub.f32 %v403_v7, %v439_v23  ;;  %v118_v26 = vsub.f32 %v408_v8, %v441_v24  ;;  %v166_v36 = vpop.permute.xlu2 %165 }
  0x80   :  { %vm179_vm1 = vcmp.eq.s32.totalorder %v163_v37, %v166_v36  ;;  %v221_v36 = vld [vmem:[#allocation2 + $0x20] sm:$0xff] }
  0x81   :  { %v316_v28 = vpop.eup %315  ;;  %v128_v29 = vmul.f32 1.442695, %v120_v25  ;;  %v124_v30 = vmul.f32 1.442695, %v118_v26  ;;  %v184_v43 = vsel %vm179_vm1, %v387_v1, 0.0  ;;  %v220_v25 = vld [vmem:[#allocation2 + $0x18] sm:$0xff] }
  0x82   :  { %v318_v31 = vpop.eup %317  ;;  %v138_v32 = vsel %vm101_vm0, %v316_v28, 0.0  ;;  %v189_v45 = vsel %vm101_vm0, %v184_v43, 0.0  ;;  %v206_v28 = vshrl.u32 %v162_v33, 7 }
  0x83   :  { %319 = vpow2.f32 %v128_v29  ;;  %139 = vadd.xlane.f32.xlu0 %v138_v32  ;;  %v132_v34 = vsel %vm101_vm0, %v318_v31, 0.0 }
  0x84   :  { %321 = vpow2.f32 %v124_v30  ;;  %133 = vadd.xlane.f32.xlu1 %v132_v34 }
  0x85   :  { %323 = vpow2.f32 %v130_v35  ;;  %v210_v35 = vadd.s32 32, %v206_v28 }
  0x87   :  { %v175_v44 = vpop.permute.xlu2 %174  ;;  %vm226_vm7 = vcmp.lt.s32.totalorder %v210_v35, 37 }
  0x88   :  { %vm182_vm3 = vcmp.eq.s32.totalorder %v163_v37, %v175_v44 }
  0x89   :  { %v320_v38 = vpop.eup %319  ;;  %v187_v51 = vsel %vm182_vm3, %v403_v7, 0.0 }
  0x8a   :  { %v322_v39 = vpop.eup %321  ;;  %v141_v40 = vsel %vm101_vm0, %v320_v38, 0.0  ;;  %v198_v55 = vsel %vm101_vm0, %v187_v51, 0.0 }
  0x8b   :  { %v135_v41 = vsel %vm101_vm0, %v322_v39, 0.0  ;;  %v324_v42 = vpop.eup %323 }
  0x8c   :  { %142 = vadd.xlane.f32.xlu1 %v141_v40  ;;  %136 = vadd.xlane.f32.xlu2 %v135_v41  ;;  %v144_v46 = vsel %vm101_vm0, %v324_v42, 0.0 }
  0x8f   :  { %v178_v54 = vpop.permute.xlu2 %177 }
  0x90   :  { %vm183_vm5 = vcmp.eq.s32.totalorder %v163_v37, %v178_v54 }
  0x91   :  { %v169_v47 = vpop.permute.xlu0 %168  ;;  %v188_v56 = vsel %vm183_vm5, %v392_v2, 0.0 }
  0x92   :  { %vm180_vm2 = vcmp.eq.s32.totalorder %v163_v37, %v169_v47  ;;  %v201_v57 = vsel %vm101_vm0, %v188_v56, 0.0 }
  0x93   :  { %v185_v49 = vsel %vm180_vm2, %v408_v8, 0.0 }
  0x94   :  { %190 = vadd.xlane.f32.xlu1 %v189_v45  ;;  %145 = vadd.xlane.f32.xlu2 %v144_v46  ;;  %v192_v53 = vsel %vm101_vm0, %v185_v49, 0.0 }
  0x96   :  { %v172_v48 = vpop.permute.xlu1 %171 }
  0x97   :  { %vm181_vm4 = vcmp.eq.s32.totalorder %v163_v37, %v172_v48 }
  0x98   :  { %v186_v50 = vsel %vm181_vm4, %v382_v0, 0.0 }
  0x99   :  { %v195_v52 = vsel %vm101_vm0, %v186_v50, 0.0 }
  0x9a   :  { %196 = vadd.xlane.f32.xlu0 %v195_v52 }
  0x9c   :  { %199 = vadd.xlane.f32.xlu1 %v198_v55  ;;  %193 = vadd.xlane.f32.xlu2 %v192_v53 }
  0xa4   :  { %202 = vadd.xlane.f32.xlu2 %v201_v57 }
  0xf6   :  { %v140_v60 = vpop.xlane.xlu0 %139 }
  0xf7   :  { %v134_v59 = vpop.xlane.xlu1 %133 }
  0xf8   :  { %325 = vlog2.f32 %v134_v59 }
  0xf9   :  { %327 = vlog2.f32 %v140_v60 }
  0xfe   :  { %v326_v61 = vpop.eup %325 }
  0xff   :  { %v143_v62 = vpop.xlane.xlu1 %142  ;;  %v137_v63 = vpop.xlane.xlu2 %136  ;;  %v148_v0 = vmul.f32 0.6931472, %v326_v61 }
 0x100   :  { %329 = vlog2.f32 %v143_v62  ;;  %v328_v1 = vpop.eup %327 }
 0x101   :  { %331 = vlog2.f32 %v137_v63  ;;  %v157_v3 = vadd.f32 %v148_v0, %v431_v17  ;;  %v152_v8 = vmul.f32 0.6931472, %v328_v1 }
 0x103   :  { %v159_v13 = vadd.f32 %v152_v8, %v429_v16 }
 0x106   :  { %v330_v2 = vpop.eup %329 }
 0x107   :  { %v332_v4 = vpop.eup %331  ;;  %v191_v5 = vpop.xlane.xlu1 %190  ;;  %v154_v10 = vmul.f32 0.6931472, %v330_v2 }
 0x108   :  { %v146_v7 = vpop.xlane.xlu2 %145  ;;  %v227_v9 = vsub.f32 %v157_v3, %v191_v5  ;;  %v150_v11 = vmul.f32 0.6931472, %v332_v4 }
 0x109   :  { %333 = vlog2.f32 %v146_v7  ;;  %v160_v19 = vadd.f32 %v154_v10, %v439_v23 }
 0x10a   :  { %v237_v12 = vadd.f32 %v227_v9, %v217_v6  ;;  %v158_v17 = vadd.f32 %v150_v11, %v441_v24 }
 0x10c   :  { %243 = vst.msk [vmem:[#allocation2] sm:$0xff] %vm81_vm6, %v237_v12 }
 0x10d   :  { %v197_v14 = vpop.xlane.xlu0 %196 }
 0x10e   :  { %v229_v18 = vsub.f32 %v159_v13, %v197_v14 }
 0x10f   :  { %v334_v20 = vpop.eup %333  ;;  %v200_v21 = vpop.xlane.xlu1 %199 }
 0x110   :  { %v194_v26 = vpop.xlane.xlu2 %193  ;;  %v239_v29 = vadd.f32 %v229_v18, %v219_v15  ;;  %v230_v30 = vsub.f32 %v160_v19, %v200_v21  ;;  %v156_v32 = vmul.f32 0.6931472, %v334_v20 }
 0x111   :  { %v228_v31 = vsub.f32 %v158_v17, %v194_v26 }
 0x112   :  { %245 = vst.msk [vmem:[#allocation2 + $0x10] sm:$0xff] %vm81_vm6, %v239_v29  ;;  %v240_v16 = vadd.f32 %v230_v30, %v220_v25  ;;  %v161_v23 = vadd.f32 %v156_v32, %v437_v22 }
 0x113   :  { %v238_v34 = vadd.f32 %v228_v31, %v218_v27  ;;  %v251_v38 = vld [vmem:[#allocation2] sm:$0xff] }
 0x114   :  { %246 = vst.msk [vmem:[#allocation2 + $0x18] sm:$0xff] %vm81_vm6, %v240_v16  ;;  %v257_v42 = vsel %vm81_vm6, %v251_v38, 0.0 }
 0x115   :  { %244 = vst.msk [vmem:[#allocation2 + $0x8] sm:$0xff] %vm81_vm6, %v238_v34 }
 0x118   :  { %v203_v24 = vpop.xlane.xlu2 %202 }
 0x119   :  { %v231_v37 = vsub.f32 %v161_v23, %v203_v24  ;;  %v253_v41 = vld [vmem:[#allocation2 + $0x10] sm:$0xff] }
 0x11a   :  { %v260_v45 = vsel %vm81_vm6, %v253_v41, 0.0 }
 0x11b   :  { %v236_v33 = vsel %vm226_vm7, %v231_v37, 0.0  ;;  %v254_v46 = vld [vmem:[#allocation2 + $0x18] sm:$0xff] }
 0x11c   :  { %v241_v39 = vadd.f32 %v236_v33, %v221_v36  ;;  %v252_v40 = vld [vmem:[#allocation2 + $0x8] sm:$0xff]  ;;  %v262_v47 = vsel %vm81_vm6, %v254_v46, 0.0 }
 0x11d   :  { %v258_v43 = vsel %vm81_vm6, %v252_v40, 0.0 }
 0x11e   :  { %247 = vst.msk [vmem:[#allocation2 + $0x20] sm:$0xff] %vm81_vm6, %v241_v39  ;;  %v259_v44 = vadd.f32 %v258_v43, %v257_v42 }
 0x120   :  { %v261_v22 = vadd.f32 %v260_v45, %v259_v44 }
 0x122   :  { %v263_v49 = vadd.f32 %v262_v47, %v261_v22 }
 0x125   :  { %v255_v48 = vld [vmem:[#allocation2 + $0x20] sm:$0xff] }
 0x126   :  { %v264_v50 = vsel %vm81_vm6, %v255_v48, 0.0 }
 0x127   :  { %v265_v51 = vadd.f32 %v264_v50, %v263_v49 }
 0x129   :  { %266 = vadd.xlane.f32.xlu0 %v265_v51 }
 0x19c   :  { %v267_v52 = vpop.xlane.xlu0 %266 }
 0x19d   :  { %v268_v53 = vrot.slane %v267_v52, 4 }
 0x19f   :  { %v269_v54 = vadd.f32 %v268_v53, %v267_v52 }
 0x1a1   :  { %v270_v55 = vrot.slane %v269_v54, 2 }
 0x1a3   :  { %v271_v56 = vadd.f32 %v270_v55, %v269_v54 }
 0x1a5   :  { %v272_v57 = vrot.slane %v271_v56, 1 }
 0x1a7   :  { %v273_v58 = vadd.f32 %v272_v57, %v271_v56 }
 0x1a9   :  { %307 = vpush %v273_v58 }
 0x1da   :  { %s308_s4 = spop %307 }
 0x1db   :  { %s275_s5 = smul.f32 0.027027028, %s308_s4 }
 0x1dd   :  { %v276_v59 = vstv %s275_s5 }
 0x1de   :  { %278 = vst.msk [vmem:[#allocation3] sm:$0x1] %vm277_vm8, %v276_v59 }
 0x1df   :  { %289 = dma.vmem_to_hbm [thread:$0]  %s285_s28, 16, %s287_s3, [#allocation4]  }
 0x1e0   :  { %359 = dma.done.wait [#allocation4], 16  }
 0x1e1   :  { %360 = vsyncadd [#allocation4], 4294967280 }
 0x1e2   :  { %294 = vsyncpa [#allocation4], 1 }

</bundles_post_ra>
